<compile_context>
chip_gen: v7x
topology: tpu7x:2x2x1
jax: 0.10.0
libtpu: 0.0.40
codegen_flags: <defaults>
</compile_context>

<pallas_src>
import functools

import jax
import jax.numpy as jnp
import numpy as np
from jax.experimental import pallas as pl
from jax.experimental.pallas import tpu as pltpu


def _spatial_att_kernel(w_ref, x_ref, o_ref, *, num_segments, channels, h, w):
    # w_ref : (27,) f32 in SMEM -- flattened 3x3x3 conv weight (no bias)
    # x_ref : (Bblk, T*C, H*W) in VMEM -- lane-dense, sublane-packed
    # o_ref : (Bblk, T*C, H*W)
    T, C, H, W = num_segments, channels, h, w
    HW = H * W
    bblk = x_ref.shape[0]
    f32 = jnp.float32

    # Hoist all 27 scalar weight reads above every loop.
    wv = [w_ref[i] for i in range(27)]

    # Lane-coordinate border masks for the 9 spatial taps (shared across
    # batch rows and frames).  None == centre tap (no masking needed).
    lane = jax.lax.broadcasted_iota(jnp.int32, (T + 2, HW), 1)
    col = lane % W
    masks = {}
    for oh in (-1, 0, 1):
        for ow in (-1, 0, 1):
            m = None
            if ow == 1:
                m = col < (W - 1)
            elif ow == -1:
                m = col >= 1
            if oh == 1:
                mh = lane < (H - 1) * W
                m = mh if m is None else (m & mh)
            elif oh == -1:
                mh = lane >= W
                m = mh if m is None else (m & mh)
            masks[(oh, ow)] = m

    # 0/1 selection matrices (built once from iota; ride the MXU):
    #   R (T, T*C):   channel sum          s        = R @ x
    #   E (T*C, T):   broadcast expansion  att_rows = E @ att
    r_row = jax.lax.broadcasted_iota(jnp.int32, (T, T * C), 0)
    r_col = jax.lax.broadcasted_iota(jnp.int32, (T, T * C), 1)
    R = ((r_col >= r_row * C) & (r_col < (r_row + 1) * C)).astype(f32)
    e_row = jax.lax.broadcasted_iota(jnp.int32, (T * C, T), 0)
    e_col = jax.lax.broadcasted_iota(jnp.int32, (T * C, T), 1)
    E = ((e_row >= e_col * C) & (e_row < (e_col + 1) * C)).astype(f32)

    zrow = jnp.zeros((1, HW), f32)

    for b in range(bblk):
        x = x_ref[b].astype(f32)                      # (T*C, HW) single dense read

        # Channel sum -> (T, HW); add zero temporal-halo rows -> (T+2, HW).
        s = jnp.dot(R, x, preferred_element_type=f32,
                    precision=jax.lax.Precision.HIGHEST)
        sp = jnp.concatenate([zrow, s, zrow], axis=0)

        # 3x3x3 "same" cross-correlation: 9 lane rolls (dh/dw) reused for the
        # 3 temporal taps via leading-axis slicing.  3 independent
        # accumulator chains (one per dt) for VALU ILP.
        acc = [jnp.zeros((T, HW), f32) for _ in range(3)]
        for oh in (-1, 0, 1):
            for ow in (-1, 0, 1):
                d = oh * W + ow
                slab = sp if d == 0 else pltpu.roll(sp, (-d) % HW, axis=1)
                m = masks[(oh, ow)]
                if m is not None:
                    slab = jnp.where(m, slab, 0.0)
                for dt in range(3):
                    wgt = wv[dt * 9 + (oh + 1) * 3 + (ow + 1)]
                    acc[dt] = acc[dt] + wgt * slab[dt:dt + T]

        att = jax.nn.sigmoid(acc[0] + acc[1] + acc[2])            # (T, HW)
        att_rows = jnp.dot(E, att, preferred_element_type=f32,
                           precision=jax.lax.Precision.HIGHEST)   # (T*C, HW)
        o_ref[b] = (x * att_rows).astype(o_ref.dtype)


def _pick_block_batch(nb, bytes_per_batch_elem):
    """Largest divisor of nb that (a) keeps >=2 grid steps (v7x megacore) and
    (b) keeps the per-step in+out tile near ~512 KiB."""
    target = max(1, (512 * 1024) // max(1, bytes_per_batch_elem))
    best = 1
    for d in range(1, nb + 1):
        if nb % d == 0 and d <= target and (nb // d >= 2 or nb <= 1):
            best = d
    return best


def spatial_attention_3(x, conv_w, num_segments, block_batch=None):
    """x: (nt, c, h, w); conv_w: (3, 3, 3) Conv3d(1, 1, 3, bias=False) weight."""
    nt, c, h, w = x.shape
    assert nt % num_segments == 0, "nt must be divisible by num_segments"
    nb = nt // num_segments
    T = num_segments
    hw = h * w
    # Lane-dense layout needs a 128-multiple last dim (true for 16x16).
    assert hw % 128 == 0, "h*w must be a multiple of 128 for the lane-dense kernel"

    # Pure metadata reshape: (nt, c, h, w) -> (nb, T*c, h*w); fully packed
    # (8,128) tiles for both the input read and the output write.
    x3 = x.reshape(nb, T * c, hw)
    w_flat = conv_w.reshape(27).astype(jnp.float32)

    if block_batch is None:
        bytes_per_b = 2 * T * c * hw * x.dtype.itemsize      # in + out per batch elem
        block_batch = _pick_block_batch(nb, bytes_per_b)
    assert nb % block_batch == 0

    kernel = functools.partial(_spatial_att_kernel,
                               num_segments=T, channels=c, h=h, w=w)
    out = pl.pallas_call(
        kernel,
        out_shape=jax.ShapeDtypeStruct((nb, T * c, hw), x.dtype),
        grid=(nb // block_batch,),
        in_specs=[
            pl.BlockSpec(memory_space=pltpu.MemorySpace.SMEM),           # weights
            pl.BlockSpec((block_batch, T * c, hw), lambda i: (i, 0, 0)),  # x block
        ],
        out_specs=pl.BlockSpec((block_batch, T * c, hw), lambda i: (i, 0, 0)),
        compiler_params=pltpu.CompilerParams(
            dimension_semantics=("parallel",)),   # batch steps are independent
    )(w_flat, x3)
    return out.reshape(nt, c, h, w)


def _reference(x, conv_w, num_segments):
    """Pure-JAX reference mirroring the PyTorch forward."""
    nt, c, h, w = x.shape
    nb = nt // num_segments
    x5 = x.reshape(nb, num_segments, c, h, w)
    s = x5.sum(axis=2)                                     # (B, T, H, W)
    sp = jnp.pad(s, ((0, 0), (1, 1), (1, 1), (1, 1)))
    conv = jnp.zeros_like(s)
    for dt in range(3):
        for dh in range(3):
            for dw in range(3):
                conv = conv + conv_w[dt, dh, dw] * sp[:, dt:dt + num_segments,
                                                      dh:dh + h, dw:dw + w]
    att = jax.nn.sigmoid(conv)                             # (B, T, H, W)
    out = x5 * att[:, :, None, :, :]
    return out.reshape(nt, c, h, w)


if __name__ == "__main__":
    # Module config: inplanes=4 channels, num_segments=4; n_batch=2 -> nt=8.
    num_segments = 4
    n_batch = 2
    c, h, w = 4, 16, 16
    nt = n_batch * num_segments

    key = jax.random.PRNGKey(0)
    kx, kw = jax.random.split(key)
    x = jax.random.normal(kx, (nt, c, h, w), dtype=jnp.float32)

    # Deterministic Conv3d(1, 1, (3,3,3), bias=False) weight:
    # PyTorch default kaiming-uniform bound = 1/sqrt(fan_in), fan_in = 27.
    bound = 1.0 / np.sqrt(27.0)
    conv_w = jax.random.uniform(kw, (3, 3, 3), dtype=jnp.float32,
                                minval=-bound, maxval=bound)

    out = spatial_attention_3(x, conv_w, num_segments)
    out = jax.block_until_ready(out)

    ref = _reference(x, conv_w, num_segments)
    assert out.shape == (nt, c, h, w)
    np.testing.assert_allclose(np.asarray(out), np.asarray(ref),
                               rtol=1e-5, atol=1e-5)
    print("KERNEL_OK")
</pallas_src>

<mosaic_0001>
module attributes {stable_mosaic.version = 11 : i64} {
  func.func @_spatial_att_kernel(%arg0: i32, %arg1: memref<27xf32, #tpu.memory_space<smem>>, %arg2: memref<1x16x256xf32, #tpu.memory_space<vmem>>, %arg3: memref<1x16x256xf32, #tpu.memory_space<vmem>>) attributes {dimension_semantics = [#tpu.dimension_semantics<parallel>], iteration_bounds = array<i64: 2>, scalar_prefetch = 0 : i64, scratch_operands = 0 : i64, tpu.core_type = #tpu.core_type<tc>, window_params = [{transform_indices = @transform_0, window_bounds = array<i64: 27>}, {transform_indices = @transform_1, window_bounds = array<i64: 1, 16, 256>}, {transform_indices = @transform_2, window_bounds = array<i64: 1, 16, 256>}]} {
    %c0 = arith.constant 0 : index
    %0 = memref.load %arg1[%c0] : memref<27xf32, #tpu.memory_space<smem>>
    %c1 = arith.constant 1 : index
    %1 = memref.load %arg1[%c1] : memref<27xf32, #tpu.memory_space<smem>>
    %c2 = arith.constant 2 : index
    %2 = memref.load %arg1[%c2] : memref<27xf32, #tpu.memory_space<smem>>
    %c3 = arith.constant 3 : index
    %3 = memref.load %arg1[%c3] : memref<27xf32, #tpu.memory_space<smem>>
    %c4 = arith.constant 4 : index
    %4 = memref.load %arg1[%c4] : memref<27xf32, #tpu.memory_space<smem>>
    %c5 = arith.constant 5 : index
    %5 = memref.load %arg1[%c5] : memref<27xf32, #tpu.memory_space<smem>>
    %c6 = arith.constant 6 : index
    %6 = memref.load %arg1[%c6] : memref<27xf32, #tpu.memory_space<smem>>
    %c7 = arith.constant 7 : index
    %7 = memref.load %arg1[%c7] : memref<27xf32, #tpu.memory_space<smem>>
    %c8 = arith.constant 8 : index
    %8 = memref.load %arg1[%c8] : memref<27xf32, #tpu.memory_space<smem>>
    %c9 = arith.constant 9 : index
    %9 = memref.load %arg1[%c9] : memref<27xf32, #tpu.memory_space<smem>>
    %c10 = arith.constant 10 : index
    %10 = memref.load %arg1[%c10] : memref<27xf32, #tpu.memory_space<smem>>
    %c11 = arith.constant 11 : index
    %11 = memref.load %arg1[%c11] : memref<27xf32, #tpu.memory_space<smem>>
    %c12 = arith.constant 12 : index
    %12 = memref.load %arg1[%c12] : memref<27xf32, #tpu.memory_space<smem>>
    %c13 = arith.constant 13 : index
    %13 = memref.load %arg1[%c13] : memref<27xf32, #tpu.memory_space<smem>>
    %c14 = arith.constant 14 : index
    %14 = memref.load %arg1[%c14] : memref<27xf32, #tpu.memory_space<smem>>
    %c15 = arith.constant 15 : index
    %15 = memref.load %arg1[%c15] : memref<27xf32, #tpu.memory_space<smem>>
    %c16 = arith.constant 16 : index
    %16 = memref.load %arg1[%c16] : memref<27xf32, #tpu.memory_space<smem>>
    %c17 = arith.constant 17 : index
    %17 = memref.load %arg1[%c17] : memref<27xf32, #tpu.memory_space<smem>>
    %c18 = arith.constant 18 : index
    %18 = memref.load %arg1[%c18] : memref<27xf32, #tpu.memory_space<smem>>
    %c19 = arith.constant 19 : index
    %19 = memref.load %arg1[%c19] : memref<27xf32, #tpu.memory_space<smem>>
    %c20 = arith.constant 20 : index
    %20 = memref.load %arg1[%c20] : memref<27xf32, #tpu.memory_space<smem>>
    %c21 = arith.constant 21 : index
    %21 = memref.load %arg1[%c21] : memref<27xf32, #tpu.memory_space<smem>>
    %c22 = arith.constant 22 : index
    %22 = memref.load %arg1[%c22] : memref<27xf32, #tpu.memory_space<smem>>
    %c23 = arith.constant 23 : index
    %23 = memref.load %arg1[%c23] : memref<27xf32, #tpu.memory_space<smem>>
    %c24 = arith.constant 24 : index
    %24 = memref.load %arg1[%c24] : memref<27xf32, #tpu.memory_space<smem>>
    %c25 = arith.constant 25 : index
    %25 = memref.load %arg1[%c25] : memref<27xf32, #tpu.memory_space<smem>>
    %c26 = arith.constant 26 : index
    %26 = memref.load %arg1[%c26] : memref<27xf32, #tpu.memory_space<smem>>
    %27 = tpu.iota {dimensions = array<i32: 1>} : vector<6x256xi32>
    %c16_i32 = arith.constant 16 : i32
    %c0_i32 = arith.constant 0 : i32
    %28 = arith.cmpi eq, %c16_i32, %c0_i32 : i32
    %c1_i32 = arith.constant 1 : i32
    %29 = arith.select %28, %c1_i32, %c16_i32 : i32
    %30 = vector.broadcast %29 : i32 to vector<6x256xi32>
    %31 = arith.remsi %27, %30 : vector<6x256xi32>
    %c0_i32_0 = arith.constant 0 : i32
    %32 = vector.broadcast %c0_i32_0 : i32 to vector<6x256xi32>
    %33 = arith.cmpi ne, %31, %32 : vector<6x256xi32>
    %c0_i32_1 = arith.constant 0 : i32
    %34 = vector.broadcast %c0_i32_1 : i32 to vector<6x256xi32>
    %35 = arith.cmpi slt, %31, %34 : vector<6x256xi32>
    %c0_i32_2 = arith.constant 0 : i32
    %36 = arith.cmpi slt, %29, %c0_i32_2 : i32
    %37 = vector.broadcast %36 : i1 to vector<6x256xi1>
    %38 = vector.broadcast %37 : vector<6x256xi1> to vector<6x256xi1>
    %39 = arith.xori %35, %38 : vector<6x256xi1>
    %40 = arith.andi %39, %33 : vector<6x256xi1>
    %41 = vector.broadcast %29 : i32 to vector<6x256xi32>
    %42 = arith.addi %31, %41 : vector<6x256xi32>
    %43 = arith.select %40, %42, %31 : vector<6x256xi1>, vector<6x256xi32>
    %c1_i32_3 = arith.constant 1 : i32
    %44 = vector.broadcast %c1_i32_3 : i32 to vector<6x256xi32>
    %45 = arith.cmpi sge, %43, %44 : vector<6x256xi32>
    %c16_i32_4 = arith.constant 16 : i32
    %46 = vector.broadcast %c16_i32_4 : i32 to vector<6x256xi32>
    %47 = arith.cmpi sge, %27, %46 : vector<6x256xi32>
    %48 = arith.andi %45, %47 : vector<6x256xi1>
    %c16_i32_5 = arith.constant 16 : i32
    %49 = vector.broadcast %c16_i32_5 : i32 to vector<6x256xi32>
    %50 = arith.cmpi sge, %27, %49 : vector<6x256xi32>
    %c15_i32 = arith.constant 15 : i32
    %51 = vector.broadcast %c15_i32 : i32 to vector<6x256xi32>
    %52 = arith.cmpi slt, %43, %51 : vector<6x256xi32>
    %c16_i32_6 = arith.constant 16 : i32
    %53 = vector.broadcast %c16_i32_6 : i32 to vector<6x256xi32>
    %54 = arith.cmpi sge, %27, %53 : vector<6x256xi32>
    %55 = arith.andi %52, %54 : vector<6x256xi1>
    %c1_i32_7 = arith.constant 1 : i32
    %56 = vector.broadcast %c1_i32_7 : i32 to vector<6x256xi32>
    %57 = arith.cmpi sge, %43, %56 : vector<6x256xi32>
    %c15_i32_8 = arith.constant 15 : i32
    %58 = vector.broadcast %c15_i32_8 : i32 to vector<6x256xi32>
    %59 = arith.cmpi slt, %43, %58 : vector<6x256xi32>
    %c1_i32_9 = arith.constant 1 : i32
    %60 = vector.broadcast %c1_i32_9 : i32 to vector<6x256xi32>
    %61 = arith.cmpi sge, %43, %60 : vector<6x256xi32>
    %c240_i32 = arith.constant 240 : i32
    %62 = vector.broadcast %c240_i32 : i32 to vector<6x256xi32>
    %63 = arith.cmpi slt, %27, %62 : vector<6x256xi32>
    %64 = arith.andi %61, %63 : vector<6x256xi1>
    %c240_i32_10 = arith.constant 240 : i32
    %65 = vector.broadcast %c240_i32_10 : i32 to vector<6x256xi32>
    %66 = arith.cmpi slt, %27, %65 : vector<6x256xi32>
    %c15_i32_11 = arith.constant 15 : i32
    %67 = vector.broadcast %c15_i32_11 : i32 to vector<6x256xi32>
    %68 = arith.cmpi slt, %43, %67 : vector<6x256xi32>
    %c240_i32_12 = arith.constant 240 : i32
    %69 = vector.broadcast %c240_i32_12 : i32 to vector<6x256xi32>
    %70 = arith.cmpi slt, %27, %69 : vector<6x256xi32>
    %71 = arith.andi %68, %70 : vector<6x256xi1>
    %72 = tpu.iota {dimensions = array<i32: 0>} : vector<4x16xi32>
    %73 = tpu.iota {dimensions = array<i32: 1>} : vector<4x16xi32>
    %c4_i32 = arith.constant 4 : i32
    %74 = vector.broadcast %c4_i32 : i32 to vector<4x16xi32>
    %75 = arith.muli %72, %74 : vector<4x16xi32>
    %76 = arith.cmpi sge, %73, %75 : vector<4x16xi32>
    %c1_i32_13 = arith.constant 1 : i32
    %77 = vector.broadcast %c1_i32_13 : i32 to vector<4x16xi32>
    %78 = arith.addi %72, %77 : vector<4x16xi32>
    %c4_i32_14 = arith.constant 4 : i32
    %79 = vector.broadcast %c4_i32_14 : i32 to vector<4x16xi32>
    %80 = arith.muli %78, %79 : vector<4x16xi32>
    %81 = arith.cmpi slt, %73, %80 : vector<4x16xi32>
    %82 = arith.andi %76, %81 : vector<4x16xi1>
    %83 = arith.extui %82 : vector<4x16xi1> to vector<4x16xi32>
    %84 = arith.sitofp %83 : vector<4x16xi32> to vector<4x16xf32>
    %85 = tpu.iota {dimensions = array<i32: 0>} : vector<16x4xi32>
    %86 = tpu.iota {dimensions = array<i32: 1>} : vector<16x4xi32>
    %c4_i32_15 = arith.constant 4 : i32
    %87 = vector.broadcast %c4_i32_15 : i32 to vector<16x4xi32>
    %88 = arith.muli %86, %87 : vector<16x4xi32>
    %89 = arith.cmpi sge, %85, %88 : vector<16x4xi32>
    %c1_i32_16 = arith.constant 1 : i32
    %90 = vector.broadcast %c1_i32_16 : i32 to vector<16x4xi32>
    %91 = arith.addi %86, %90 : vector<16x4xi32>
    %c4_i32_17 = arith.constant 4 : i32
    %92 = vector.broadcast %c4_i32_17 : i32 to vector<16x4xi32>
    %93 = arith.muli %91, %92 : vector<16x4xi32>
    %94 = arith.cmpi slt, %85, %93 : vector<16x4xi32>
    %95 = arith.andi %89, %94 : vector<16x4xi1>
    %96 = arith.extui %95 : vector<16x4xi1> to vector<16x4xi32>
    %97 = arith.sitofp %96 : vector<16x4xi32> to vector<16x4xf32>
    %cst = arith.constant 0.000000e+00 : f32
    %98 = vector.broadcast %cst : f32 to vector<1x256xf32>
    %c0_18 = arith.constant 0 : index
    %c0_19 = arith.constant 0 : index
    %c0_20 = arith.constant 0 : index
    %99 = vector.load %arg2[%c0_18, %c0_19, %c0_20] : memref<1x16x256xf32, #tpu.memory_space<vmem>>, vector<1x16x256xf32>
    %100 = vector.shape_cast %99 : vector<1x16x256xf32> to vector<16x256xf32>
    %cst_21 = arith.constant dense<0.000000e+00> : vector<4x256xf32>
    %101 = tpu.matmul %84, %100, %cst_21 {dimension_numbers = #tpu.dot_dimension_numbers<[1], [0], [0], [1], [0, 0, 1, 1], [], []>, precision = #tpu.contract_precision<fp32>} : vector<4x16xf32>, vector<16x256xf32>, vector<4x256xf32> -> vector<4x256xf32>
    %102 = tpu.concatenate %98, %101, %98 in 0 : vector<1x256xf32>, vector<4x256xf32>, vector<1x256xf32> -> vector<6x256xf32>
    %cst_22 = arith.constant 0.000000e+00 : f32
    %103 = vector.broadcast %cst_22 : f32 to vector<4x256xf32>
    %cst_23 = arith.constant 0.000000e+00 : f32
    %104 = vector.broadcast %cst_23 : f32 to vector<4x256xf32>
    %cst_24 = arith.constant 0.000000e+00 : f32
    %105 = vector.broadcast %cst_24 : f32 to vector<4x256xf32>
    %c17_i32 = arith.constant 17 : i32
    %106 = tpu.dynamic_rotate %102 by %c17_i32 dim 1 : vector<6x256xf32>, i32 -> vector<6x256xf32>
    %cst_25 = arith.constant 0.000000e+00 : f32
    %107 = vector.broadcast %cst_25 : f32 to vector<6x256xf32>
    %108 = arith.select %48, %106, %107 : vector<6x256xi1>, vector<6x256xf32>
    %109 = vector.extract_strided_slice %108 {offsets = [0, 0], sizes = [4, 256], strides = [1, 1]} : vector<6x256xf32> to vector<4x256xf32>
    %110 = vector.broadcast %0 : f32 to vector<4x256xf32>
    %111 = arith.mulf %110, %109 : vector<4x256xf32>
    %112 = arith.addf %103, %111 : vector<4x256xf32>
    %113 = vector.extract_strided_slice %108 {offsets = [1, 0], sizes = [4, 256], strides = [1, 1]} : vector<6x256xf32> to vector<4x256xf32>
    %114 = vector.broadcast %9 : f32 to vector<4x256xf32>
    %115 = arith.mulf %114, %113 : vector<4x256xf32>
    %116 = arith.addf %104, %115 : vector<4x256xf32>
    %117 = vector.extract_strided_slice %108 {offsets = [2, 0], sizes = [4, 256], strides = [1, 1]} : vector<6x256xf32> to vector<4x256xf32>
    %118 = vector.broadcast %18 : f32 to vector<4x256xf32>
    %119 = arith.mulf %118, %117 : vector<4x256xf32>
    %120 = arith.addf %105, %119 : vector<4x256xf32>
    %c16_i32_26 = arith.constant 16 : i32
    %121 = tpu.dynamic_rotate %102 by %c16_i32_26 dim 1 : vector<6x256xf32>, i32 -> vector<6x256xf32>
    %cst_27 = arith.constant 0.000000e+00 : f32
    %122 = vector.broadcast %cst_27 : f32 to vector<6x256xf32>
    %123 = arith.select %50, %121, %122 : vector<6x256xi1>, vector<6x256xf32>
    %124 = vector.extract_strided_slice %123 {offsets = [0, 0], sizes = [4, 256], strides = [1, 1]} : vector<6x256xf32> to vector<4x256xf32>
    %125 = vector.broadcast %1 : f32 to vector<4x256xf32>
    %126 = arith.mulf %125, %124 : vector<4x256xf32>
    %127 = arith.addf %112, %126 : vector<4x256xf32>
    %128 = vector.extract_strided_slice %123 {offsets = [1, 0], sizes = [4, 256], strides = [1, 1]} : vector<6x256xf32> to vector<4x256xf32>
    %129 = vector.broadcast %10 : f32 to vector<4x256xf32>
    %130 = arith.mulf %129, %128 : vector<4x256xf32>
    %131 = arith.addf %116, %130 : vector<4x256xf32>
    %132 = vector.extract_strided_slice %123 {offsets = [2, 0], sizes = [4, 256], strides = [1, 1]} : vector<6x256xf32> to vector<4x256xf32>
    %133 = vector.broadcast %19 : f32 to vector<4x256xf32>
    %134 = arith.mulf %133, %132 : vector<4x256xf32>
    %135 = arith.addf %120, %134 : vector<4x256xf32>
    %c15_i32_28 = arith.constant 15 : i32
    %136 = tpu.dynamic_rotate %102 by %c15_i32_28 dim 1 : vector<6x256xf32>, i32 -> vector<6x256xf32>
    %cst_29 = arith.constant 0.000000e+00 : f32
    %137 = vector.broadcast %cst_29 : f32 to vector<6x256xf32>
    %138 = arith.select %55, %136, %137 : vector<6x256xi1>, vector<6x256xf32>
    %139 = vector.extract_strided_slice %138 {offsets = [0, 0], sizes = [4, 256], strides = [1, 1]} : vector<6x256xf32> to vector<4x256xf32>
    %140 = vector.broadcast %2 : f32 to vector<4x256xf32>
    %141 = arith.mulf %140, %139 : vector<4x256xf32>
    %142 = arith.addf %127, %141 : vector<4x256xf32>
    %143 = vector.extract_strided_slice %138 {offsets = [1, 0], sizes = [4, 256], strides = [1, 1]} : vector<6x256xf32> to vector<4x256xf32>
    %144 = vector.broadcast %11 : f32 to vector<4x256xf32>
    %145 = arith.mulf %144, %143 : vector<4x256xf32>
    %146 = arith.addf %131, %145 : vector<4x256xf32>
    %147 = vector.extract_strided_slice %138 {offsets = [2, 0], sizes = [4, 256], strides = [1, 1]} : vector<6x256xf32> to vector<4x256xf32>
    %148 = vector.broadcast %20 : f32 to vector<4x256xf32>
    %149 = arith.mulf %148, %147 : vector<4x256xf32>
    %150 = arith.addf %135, %149 : vector<4x256xf32>
    %c1_i32_30 = arith.constant 1 : i32
    %151 = tpu.dynamic_rotate %102 by %c1_i32_30 dim 1 : vector<6x256xf32>, i32 -> vector<6x256xf32>
    %cst_31 = arith.constant 0.000000e+00 : f32
    %152 = vector.broadcast %cst_31 : f32 to vector<6x256xf32>
    %153 = arith.select %57, %151, %152 : vector<6x256xi1>, vector<6x256xf32>
    %154 = vector.extract_strided_slice %153 {offsets = [0, 0], sizes = [4, 256], strides = [1, 1]} : vector<6x256xf32> to vector<4x256xf32>
    %155 = vector.broadcast %3 : f32 to vector<4x256xf32>
    %156 = arith.mulf %155, %154 : vector<4x256xf32>
    %157 = arith.addf %142, %156 : vector<4x256xf32>
    %158 = vector.extract_strided_slice %153 {offsets = [1, 0], sizes = [4, 256], strides = [1, 1]} : vector<6x256xf32> to vector<4x256xf32>
    %159 = vector.broadcast %12 : f32 to vector<4x256xf32>
    %160 = arith.mulf %159, %158 : vector<4x256xf32>
    %161 = arith.addf %146, %160 : vector<4x256xf32>
    %162 = vector.extract_strided_slice %153 {offsets = [2, 0], sizes = [4, 256], strides = [1, 1]} : vector<6x256xf32> to vector<4x256xf32>
    %163 = vector.broadcast %21 : f32 to vector<4x256xf32>
    %164 = arith.mulf %163, %162 : vector<4x256xf32>
    %165 = arith.addf %150, %164 : vector<4x256xf32>
    %166 = vector.extract_strided_slice %102 {offsets = [0, 0], sizes = [4, 256], strides = [1, 1]} : vector<6x256xf32> to vector<4x256xf32>
    %167 = vector.broadcast %4 : f32 to vector<4x256xf32>
    %168 = arith.mulf %167, %166 : vector<4x256xf32>
    %169 = arith.addf %157, %168 : vector<4x256xf32>
    %170 = vector.extract_strided_slice %102 {offsets = [1, 0], sizes = [4, 256], strides = [1, 1]} : vector<6x256xf32> to vector<4x256xf32>
    %171 = vector.broadcast %13 : f32 to vector<4x256xf32>
    %172 = arith.mulf %171, %170 : vector<4x256xf32>
    %173 = arith.addf %161, %172 : vector<4x256xf32>
    %174 = vector.extract_strided_slice %102 {offsets = [2, 0], sizes = [4, 256], strides = [1, 1]} : vector<6x256xf32> to vector<4x256xf32>
    %175 = vector.broadcast %22 : f32 to vector<4x256xf32>
    %176 = arith.mulf %175, %174 : vector<4x256xf32>
    %177 = arith.addf %165, %176 : vector<4x256xf32>
    %c255_i32 = arith.constant 255 : i32
    %178 = tpu.dynamic_rotate %102 by %c255_i32 dim 1 : vector<6x256xf32>, i32 -> vector<6x256xf32>
    %cst_32 = arith.constant 0.000000e+00 : f32
    %179 = vector.broadcast %cst_32 : f32 to vector<6x256xf32>
    %180 = arith.select %59, %178, %179 : vector<6x256xi1>, vector<6x256xf32>
    %181 = vector.extract_strided_slice %180 {offsets = [0, 0], sizes = [4, 256], strides = [1, 1]} : vector<6x256xf32> to vector<4x256xf32>
    %182 = vector.broadcast %5 : f32 to vector<4x256xf32>
    %183 = arith.mulf %182, %181 : vector<4x256xf32>
    %184 = arith.addf %169, %183 : vector<4x256xf32>
    %185 = vector.extract_strided_slice %180 {offsets = [1, 0], sizes = [4, 256], strides = [1, 1]} : vector<6x256xf32> to vector<4x256xf32>
    %186 = vector.broadcast %14 : f32 to vector<4x256xf32>
    %187 = arith.mulf %186, %185 : vector<4x256xf32>
    %188 = arith.addf %173, %187 : vector<4x256xf32>
    %189 = vector.extract_strided_slice %180 {offsets = [2, 0], sizes = [4, 256], strides = [1, 1]} : vector<6x256xf32> to vector<4x256xf32>
    %190 = vector.broadcast %23 : f32 to vector<4x256xf32>
    %191 = arith.mulf %190, %189 : vector<4x256xf32>
    %192 = arith.addf %177, %191 : vector<4x256xf32>
    %c241_i32 = arith.constant 241 : i32
    %193 = tpu.dynamic_rotate %102 by %c241_i32 dim 1 : vector<6x256xf32>, i32 -> vector<6x256xf32>
    %cst_33 = arith.constant 0.000000e+00 : f32
    %194 = vector.broadcast %cst_33 : f32 to vector<6x256xf32>
    %195 = arith.select %64, %193, %194 : vector<6x256xi1>, vector<6x256xf32>
    %196 = vector.extract_strided_slice %195 {offsets = [0, 0], sizes = [4, 256], strides = [1, 1]} : vector<6x256xf32> to vector<4x256xf32>
    %197 = vector.broadcast %6 : f32 to vector<4x256xf32>
    %198 = arith.mulf %197, %196 : vector<4x256xf32>
    %199 = arith.addf %184, %198 : vector<4x256xf32>
    %200 = vector.extract_strided_slice %195 {offsets = [1, 0], sizes = [4, 256], strides = [1, 1]} : vector<6x256xf32> to vector<4x256xf32>
    %201 = vector.broadcast %15 : f32 to vector<4x256xf32>
    %202 = arith.mulf %201, %200 : vector<4x256xf32>
    %203 = arith.addf %188, %202 : vector<4x256xf32>
    %204 = vector.extract_strided_slice %195 {offsets = [2, 0], sizes = [4, 256], strides = [1, 1]} : vector<6x256xf32> to vector<4x256xf32>
    %205 = vector.broadcast %24 : f32 to vector<4x256xf32>
    %206 = arith.mulf %205, %204 : vector<4x256xf32>
    %207 = arith.addf %192, %206 : vector<4x256xf32>
    %c240_i32_34 = arith.constant 240 : i32
    %208 = tpu.dynamic_rotate %102 by %c240_i32_34 dim 1 : vector<6x256xf32>, i32 -> vector<6x256xf32>
    %cst_35 = arith.constant 0.000000e+00 : f32
    %209 = vector.broadcast %cst_35 : f32 to vector<6x256xf32>
    %210 = arith.select %66, %208, %209 : vector<6x256xi1>, vector<6x256xf32>
    %211 = vector.extract_strided_slice %210 {offsets = [0, 0], sizes = [4, 256], strides = [1, 1]} : vector<6x256xf32> to vector<4x256xf32>
    %212 = vector.broadcast %7 : f32 to vector<4x256xf32>
    %213 = arith.mulf %212, %211 : vector<4x256xf32>
    %214 = arith.addf %199, %213 : vector<4x256xf32>
    %215 = vector.extract_strided_slice %210 {offsets = [1, 0], sizes = [4, 256], strides = [1, 1]} : vector<6x256xf32> to vector<4x256xf32>
    %216 = vector.broadcast %16 : f32 to vector<4x256xf32>
    %217 = arith.mulf %216, %215 : vector<4x256xf32>
    %218 = arith.addf %203, %217 : vector<4x256xf32>
    %219 = vector.extract_strided_slice %210 {offsets = [2, 0], sizes = [4, 256], strides = [1, 1]} : vector<6x256xf32> to vector<4x256xf32>
    %220 = vector.broadcast %25 : f32 to vector<4x256xf32>
    %221 = arith.mulf %220, %219 : vector<4x256xf32>
    %222 = arith.addf %207, %221 : vector<4x256xf32>
    %c239_i32 = arith.constant 239 : i32
    %223 = tpu.dynamic_rotate %102 by %c239_i32 dim 1 : vector<6x256xf32>, i32 -> vector<6x256xf32>
    %cst_36 = arith.constant 0.000000e+00 : f32
    %224 = vector.broadcast %cst_36 : f32 to vector<6x256xf32>
    %225 = arith.select %71, %223, %224 : vector<6x256xi1>, vector<6x256xf32>
    %226 = vector.extract_strided_slice %225 {offsets = [0, 0], sizes = [4, 256], strides = [1, 1]} : vector<6x256xf32> to vector<4x256xf32>
    %227 = vector.broadcast %8 : f32 to vector<4x256xf32>
    %228 = arith.mulf %227, %226 : vector<4x256xf32>
    %229 = arith.addf %214, %228 : vector<4x256xf32>
    %230 = vector.extract_strided_slice %225 {offsets = [1, 0], sizes = [4, 256], strides = [1, 1]} : vector<6x256xf32> to vector<4x256xf32>
    %231 = vector.broadcast %17 : f32 to vector<4x256xf32>
    %232 = arith.mulf %231, %230 : vector<4x256xf32>
    %233 = arith.addf %218, %232 : vector<4x256xf32>
    %234 = vector.extract_strided_slice %225 {offsets = [2, 0], sizes = [4, 256], strides = [1, 1]} : vector<6x256xf32> to vector<4x256xf32>
    %235 = vector.broadcast %26 : f32 to vector<4x256xf32>
    %236 = arith.mulf %235, %234 : vector<4x256xf32>
    %237 = arith.addf %222, %236 : vector<4x256xf32>
    %238 = arith.addf %229, %233 : vector<4x256xf32>
    %239 = arith.addf %238, %237 : vector<4x256xf32>
    %240 = arith.negf %239 : vector<4x256xf32>
    %241 = math.exp %240 : vector<4x256xf32>
    %cst_37 = arith.constant 1.000000e+00 : f32
    %242 = vector.broadcast %cst_37 : f32 to vector<4x256xf32>
    %243 = arith.addf %242, %241 : vector<4x256xf32>
    %244 = arith.divf %242, %243 : vector<4x256xf32>
    %cst_38 = arith.constant dense<0.000000e+00> : vector<16x256xf32>
    %245 = tpu.matmul %97, %244, %cst_38 {dimension_numbers = #tpu.dot_dimension_numbers<[1], [0], [0], [1], [0, 0, 1, 1], [], []>, precision = #tpu.contract_precision<fp32>} : vector<16x4xf32>, vector<4x256xf32>, vector<16x256xf32> -> vector<16x256xf32>
    %246 = arith.mulf %100, %245 : vector<16x256xf32>
    %c0_39 = arith.constant 0 : index
    %c0_40 = arith.constant 0 : index
    %c0_41 = arith.constant 0 : index
    %247 = vector.load %arg3[%c0_39, %c0_40, %c0_41] : memref<1x16x256xf32, #tpu.memory_space<vmem>>, vector<1x16x256xf32>
    %248 = vector.shape_cast %247 : vector<1x16x256xf32> to vector<16x256xf32>
    %249 = vector.shape_cast %246 : vector<16x256xf32> to vector<1x16x256xf32>
    tpu.vector_store %arg3[%c0_39, %c0_40, %c0_41], %249 {strides = array<i32>} : memref<1x16x256xf32, #tpu.memory_space<vmem>>, vector<1x16x256xf32>,
    return
  }
  func.func @transform_0(%arg0: i32) -> i32 {
    %c0_i32 = arith.constant 0 : i32
    %c0_i32_0 = arith.constant 0 : i32
    return %c0_i32 : i32
  }
  func.func @transform_1(%arg0: i32) -> (i32, i32, i32) {
    %c0_i32 = arith.constant 0 : i32
    %c0_i32_0 = arith.constant 0 : i32
    %c0_i32_1 = arith.constant 0 : i32
    return %arg0, %c0_i32, %c0_i32_0 : i32, i32, i32
  }
  func.func @transform_2(%arg0: i32) -> (i32, i32, i32) {
    %c0_i32 = arith.constant 0 : i32
    %c0_i32_0 = arith.constant 0 : i32
    %c0_i32_1 = arith.constant 0 : i32
    return %arg0, %c0_i32, %c0_i32_0 : i32, i32, i32
  }
}

</mosaic_0001>

<bundles_post_ra>
// kernel: tpu_custom_call.1
= control target key start
LH: loop header
LB: loop body
LE: loop exit
PB: predicated region body
PF: predicated region fallthrough
CT: control target
= control target key end

     0   :  { %s2528_s0 = inlined_call_operand.hbm [shape: f32[27], index: 0, kind: input, shape index: {}]   ;;  %s2529_s1 = inlined_call_operand.hbm [shape: f32[2,16,256], index: 1, kind: input, shape index: {}]   ;;  %s2530_s2 = inlined_call_operand.hbm [shape: f32[2,16,256], index: 2, kind: output, shape index: {}]  }
   0x1   :  { %2538 = sst [smem:[#allocation12_spill]] %s2528_s0 }
   0x2   :  { %2539 = sst [smem:[#allocation13_spill]] %s2529_s1 }
   0x3   :  { %7 = vsyncpa [#allocation5], 0 }
   0x4   :  { %8 = vsyncpa [#allocation3], 0 }
   0x5   :  { %10 = vsyncpa [#allocation3 + $0x1], 0 }
   0x6   :  { %11 = vsyncpa [#allocation4], 0 }
   0x7   :  { %13 = vsyncpa [#allocation4 + $0x1], 0  ;;  %s1985_s9 = smov 0   ;;  %s1987_s10 = smov 0  }
   0x8   :  { %s1989_s11 = smov 0   ;;  %s1991_s12 = smov 0  }
   0x9 LB: > { %s2006_s13 = sadd.s32 4294967295, %s1953_s12   ;;  %s1649_s14 = sadd.s32 4294967294, %s1953_s12   ;;  %s1953_s12 = sphi %s1991_s12, %s2577_s12   ;;  %s1949_s11 = sphi %s1989_s11, %s2576_s11   ;;  %s1945_s10 = sphi %s1987_s10, %s2575_s10   ;;  %s1941_s9 = sphi %s1985_s9, %s2574_s9  }
   0xa   : > { %s2010_s15 = sadd.s32 1, %s1953_s12   ;;  %s47_s16 = sadd.s32 1, %s1949_s11 }
   0xb   : > { %s44_s17 = ssub.s32 %s1953_s12, %s2010_s15  ;;  %p54_p0 = scmp.ne.s32.totalorder %s1949_s11, %s1945_s10 }
   0xc   : > { %p45_p1 = scmp.eq.s32.totalorder %s44_s17, 0  ;;  %p55_p2 = scmp.eq.s32.totalorder %s1953_s12, 0 }
   0xd   : > { %p60_p3 = scmp.ne.s32.totalorder %s1945_s10, %s1941_s9  ;;  %p2531_p4 = scmp.eq.s32.totalorder %s2006_s13, 0 }
   0xe   : > { %s2022_s18 = scalar_select %p45_p1, %s1949_s11, %s47_s16  }
   0xf   : > { %p2024_p5 = por %p55_p2, %p54_p0  ;;  %p2030_p6 = por %p2531_p4, %p60_p3 }
  0x10   : > { %2540 = sst [smem:[#allocation11_spill]] %s2022_s18  ;;  %p84_p7 = scmp.eq.s32.totalorder %s2006_s13, 1 }
  0x11   : > { %s2542_s20 = scalar_select %p2030_p6, 1, 0 }
  0x12   : > { %p90_p8 = scmp.eq.s32.totalorder %s1649_s14, 1  ;;  %p1650_p9 = scmp.ge.s32.totalorder %s1953_s12, 1 }
  0x13   : > { %p97_p10 = scmp.lt.s32.totalorder %s1953_s12, 3  ;;  %p2037_p11 = por %p84_p7, %p54_p0 }
  0x14   : > { %p2041_p12 = por %p90_p8, %p60_p3  ;;  %p1784_p4 = scmp.lt.s32.totalorder %s1953_s12, 2 }
  0x15   : > { %s2543_s21 = scalar_select %p2037_p11, 1, 0 }
  0x16   : > { %s2544_s22 = scalar_select %p2041_p12, 1, 0 }
  0x17   : > { %p2045_p13 = pnand %p1650_p9, %p97_p10  ;;  %s119_s24 = sand.u32 1, %s1949_s11  }
  0x18   : > { %s1705_s25 = sshll.u32 %s1953_s12, 9  ;;  %p2546_p6 = scmp.eq.s32.totalorder %s2006_s13, 0 }
  0x19   : > { %p1771_p2 = pneg %p2045_p13  ;;  %p2059_p7 = pnand %p1784_p4, %p2024_p5 }
  0x1a   : > { %s1653_s27 = sshll.u32 %s119_s24, 5  ;;  %s2548_s0 = sld [smem:[#allocation12_spill]] }
  0x1b   : > { %p1772_p0 = pnand %p1771_p2, %p2546_p6 }
  0x1d   : > { %p1842_p8 = pneg %p1772_p0 }
  0x20   : > { %s1840_s30 = scalar_lea.hbm %s2548_s0, 16 }
  0x21   : > { %p1841_p3 = scmp.ne.s32.totalorder %s2548_s0, %s1840_s30  ;;  %p1847_p6 = scmp.lt.u32.totalorder %s1840_s30, %s2548_s0 }
  0x23   : > { %p1843_p9 = pnand %p1842_p8, %p1841_p3 }
  0x25   : > { %p1844_p10 = pneg %p1843_p9 }
  0x27   : > { %p1849_p4 = pnand %p1847_p6, %p1844_p10 }
  0x29   : > { %1852 = shalt.err (!%p1849_p4)
}
  0x2a   : > { %s1955_s7 = smov [#allocation2]   ;;  %s2549_s1 = sld [smem:[#allocation13_spill]] }
  0x2b   : > { %1774 = dma.hbm_to_smem (!%p1772_p0), %s2548_s0, 16, %s1955_s7, [#allocation5]  }
  0x2c   : > { %s123_s28 = scalar_lea.vmem [#allocation6], %s1653_s27  ;;  %s2082_s30 = scalar_lea.sflag [#allocation3], %s119_s24 }
  0x2d   : > { %s130_s29 = sshll.u32 %s123_s28, 4  ;;  %p1855_p2 = pneg %p2059_p7  ;;  %s2080_s29 = int_to_ptr.vmem [resolvable:$true] %s130_s29 }
  0x30   : > { %s2078_s19 = scalar_lea.hbm %s2549_s1, %s1705_s25  ;;  %s1858_s5 = scalar_lea.hbm %s2549_s1, 1024 }
  0x31   : > { %s1853_s3 = scalar_lea.hbm %s2078_s19, 512  ;;  %p1859_p8 = scmp.lt.u32.totalorder %s2078_s19, %s2549_s1 }
  0x32   : > { %p1854_p5 = scmp.ne.s32.totalorder %s2078_s19, %s1853_s3  ;;  %p1860_p9 = scmp.lt.u32.totalorder %s1858_s5, %s1853_s3 }
  0x33   : > { %p1862_p6 = scmp.lt.u32.totalorder %s1853_s3, %s2078_s19 }
  0x34   : > { %p1856_p0 = pnand %p1855_p2, %p1854_p5  ;;  %p1861_p10 = por %p1860_p9, %p1859_p8 }
  0x36   : > { %p1857_p3 = pneg %p1856_p0  ;;  %p1863_p4 = por %p1862_p6, %p1861_p10 }
  0x38   : > { %p1864_p1 = pnand %p1863_p4, %p1857_p3 }
  0x3a   : > { %1867 = shalt.err (!%p1864_p1)
}
  0x3b   : > { %s1868_s24 = scalar_lea.vmem %s2080_s29, 512  ;;  %s1956_s27 = smov [#allocation6]  }
  0x3c   : > { %p1869_p5 = scmp.ne.s32.totalorder %s2080_s29, %s1868_s24  ;;  %s1873_s8 = sshll.u32 %s1956_s27, 4  ;;  %s1874_s8 = int_to_ptr.vmem [resolvable:$false] %s1873_s8 }
  0x3d   : > { %s1875_s14 = scalar_lea.vmem %s1874_s8, 1024  ;;  %p1876_p11 = scmp.lt.s32.totalorder %s2080_s29, %s1874_s8 }
  0x3e   : > { %p1871_p0 = pnand %p1869_p5, %p1855_p2  ;;  %p1877_p8 = scmp.lt.s32.totalorder %s1875_s14, %s1868_s24 }
  0x40   : > { %p1872_p12 = pneg %p1871_p0  ;;  %p1878_p9 = por %p1877_p8, %p1876_p11 }
  0x42   : > { %p1879_p10 = pnand %p1878_p9, %p1872_p12 }
  0x44   : > { %1882 = shalt.err (!%p1879_p10)
}
  0x45   : > { %s1957_s16 = smov 256   ;;  %s1958_s17 = smov 16  }
  0x46   : > { %1778 = dma.hbm_to_vmem [thread:$0]  (!%p2059_p7), %s2078_s19, 512, %s2080_s29, %s2082_s30, %s1957_s16, %s1957_s16, %s1958_s17  }
  0x47   : > { %142 = sbr.rel (%p2045_p13) target bundleno = 827 (0x33b), region = 28  ;;  %p2550_p1 = scmp.eq.s32.totalorder (!%p2045_p13), %s2006_s13, 0 }
  0x4e   : > { %1928 = dma.done.wait (%p2550_p1), [#allocation5], 16   ;;  %p2551_p2 = pmov %p2550_p1 }
  0x4f   : > { %s2117_s28 = sand.u32 1, %s1945_s10   ;;  %p2552_p11 = scmp.ne.s32.totalorder %s2542_s20, 0 }
  0x50   : > { %1930 = vsyncadd (%p2551_p2), [#allocation5], 4294967280  ;;  %s2535_s3 = sshll.u32 %s2117_s28, 5  ;;  %s149_s25 = scalar_lea.sflag [#allocation3], %s2117_s28 }
  0x51   : > { %s152_s26 = scalar_lea.vmem [#allocation6], %s2535_s3 }
  0x52   : > { %1932 = dma.done.wait (%p2552_p11), %s149_s25, 512  }
  0x53   : > { %1934 = vsyncadd (%p2552_p11), %s149_s25, 4294966784 }
  0x54   : > { %157 = sfence }
  0x55   : > { %v2127_v0 = vld [vmem:[%s152_s26 + $0x8] sm:$0xff]  ;;  %v2129_v1 = vld [vmem:[%s152_s26 + $0x18] sm:$0xff]  ;;  %v2131_v2 = vld [vmem:[%s152_s26] sm:$0xff]  ;;  %v201_v3 = vlaneseq  ;;  %v2536_v8 = vmov 0.0   ;;  %vm272_vm2 = vcmask 130048   ;;  %vm773_vm4 = vcmask 1040384  }
  0x56   : > { %v276_v4 = vand.u32 4294901760, %v2127_v0  ;;  %v280_v5 = vand.u32 4294901760, %v2129_v1  ;;  %v2135_v6 = vld [vmem:[%s152_s26 + $0x10] sm:$0xff]  ;;  %v278_v7 = vand.u32 4294901760, %v2131_v2  ;;  %344 = vmatprep.mubr.f32.mxu0 %v2536_v8  ;;  %1198 = vmatprep.mubr.f32.mxu1 %v2536_v8  ;;  %vm776_vm5 = vcmask 1044480   ;;  %s2534_s20 = smov 16  }
  0x57   : > { %v282_v9 = vand.u32 4294901760, %v2135_v6  ;;  %v2141_v10 = vand.u32 127, %v201_v3  ;;  %v2143_v11 = vshrl.u32 %v201_v3, 7  ;;  %s1961_s23 = smov 17   ;;  %s1962_s19 = smov 15  }
  0x58   : > { %v1707_v12 = vpack.c.bf16 %v280_v5, %v276_v4  ;;  %v357_v13 = vsub.f32 %v2127_v0, %v276_v4  ;;  %v369_v14 = vsub.f32 %v2129_v1, %v280_v5  ;;  %v363_v15 = vsub.f32 %v2131_v2, %v278_v7  ;;  %s1963_s29 = smov 1   ;;  %s1964_s30 = smov 127  }
  0x59   : > { %v1709_v16 = vpack.c.bf16 %v282_v9, %v278_v7  ;;  %v375_v17 = vsub.f32 %v2135_v6, %v282_v9  ;;  %v246_v18 = vmul.u32 4, %v2143_v11  ;;  %v248_v19 = vadd.s32 1, %v2143_v11  ;;  %s1965_s4 = smov 113   ;;  %s1966_s5 = smov 112  }
  0x5a   : > { %1708 = vmatprep.subr.bf16.mxu0 %v1707_v12  ;;  %v358_v20 = vand.u32 4294901760, %v357_v13  ;;  %v370_v21 = vand.u32 4294901760, %v369_v14  ;;  %v364_v22 = vand.u32 4294901760, %v363_v15  ;;  %v1715_v41 = vpack.c.bf16 %v369_v14, %v357_v13  ;;  %s1967_s6 = smov 111   ;;  %s2186_s7 = sld [smem:[#allocation2 + $0x4]] }
  0x5b   : > { %1710 = vmatpush1.bf16.msra.mxu0 %v1709_v16  ;;  %vm247_vm0 = vcmp.ge.s32.totalorder %v2141_v10, %v246_v18  ;;  %v249_v23 = vmul.u32 4, %v248_v19  ;;  %v376_v24 = vand.u32 4294901760, %v375_v17  ;;  %v1717_v42 = vpack.c.bf16 %v375_v17, %v363_v15  ;;  %s2188_s24 = sld [smem:[#allocation2 + $0xd]]  ;;  %s2190_s27 = sld [smem:[#allocation2 + $0x1]] }
  0x5c   : > { %v359_v25 = vsub.f32 %v357_v13, %v358_v20  ;;  %v371_v26 = vsub.f32 %v369_v14, %v370_v21  ;;  %v365_v29 = vsub.f32 %v363_v15, %v364_v22  ;;  %v1723_v43 = vpack.c.bf16 %v370_v21, %v358_v20  ;;  %s2192_s8 = sld [smem:[#allocation2 + $0x16]]  ;;  %s2194_s14 = sld [smem:[#allocation2 + $0xa]] }
  0x5d   : > { %vm250_vm1 = vcmp.lt.s32.totalorder %v2141_v10, %v249_v23  ;;  %v377_v30 = vsub.f32 %v375_v17, %v376_v24  ;;  %v1725_v44 = vpack.c.bf16 %v376_v24, %v364_v22  ;;  %s2196_s16 = sld [smem:[#allocation2 + $0x13]]  ;;  %s2198_s17 = sld [smem:[#allocation2 + $0x2]]  ;;  %v2203_v53 = vadd.s32 128, %v2141_v10 }
  0x5e   : > { %vm251_vm3 = vmand %vm247_vm0, %vm250_vm1  ;;  %v360_v27 = vand.u32 4294901760, %v359_v25  ;;  %v372_v28 = vand.u32 4294901760, %v371_v26  ;;  %v366_v35 = vand.u32 4294901760, %v365_v29  ;;  %s2200_s25 = sld [smem:[#allocation2 + $0xb]]  ;;  %s2205_s26 = sld [smem:[#allocation2 + $0x14]]  ;;  %v208_v54 = vand.u32 15, %v2141_v10 }
  0x5f   : > { %v1686_v31 = vsel %vm251_vm3, 1.0, %v2536_v8  ;;  %v378_v36 = vand.u32 4294901760, %v377_v30  ;;  %v215_v55 = vand.u32 15, %v2203_v53  ;;  %s2225_s3 = sld [smem:[#allocation2 + $0x17]]  ;;  %vm807_vm6 = vcmp.lt.s32.totalorder %v2141_v10, 16  ;;  %s2231_s0 = sld [smem:[#allocation2 + $0x6]] }
  0x60   : > { %v274_v32 = vsel %vm272_vm2, %v1686_v31, 0  ;;  %v1711_v33 = vpack.c.bf16 %v372_v28, %v360_v27  ;;  %v875_v56 = vstv %s2186_s7  ;;  %s2233_s1 = sld [smem:[#allocation2 + $0xf]]  ;;  %vm230_vm7 = vcmp.ge.s32.totalorder %v2141_v10, 16  ;;  %s2241_s18 = sld [smem:[#allocation2 + $0x18]] }
  0x61   : > { %v346_v34 = vsub.f32 %v274_v32, %v274_v32  ;;  %v1713_v39 = vpack.c.bf16 %v378_v36, %v366_v35  ;;  %v880_v57 = vstv %s2188_s24  ;;  %v812_v61 = vstv %s2190_s27  ;;  %s2243_s7 = sld [smem:[#allocation2 + $0x7]]  ;;  %s2255_s24 = sld [smem:[#allocation2 + $0x10]] }
  0x62   : > { %1712 = vmatprep.subr.bf16.mxu0 %v1711_v33  ;;  %v885_v58 = vstv %s2192_s8  ;;  %v817_v62 = vstv %s2194_s14  ;;  %vm831_vm8 = vcmp.lt.s32.totalorder %v2141_v10, 15  ;;  %vm2246_vm9 = vcmp.lt.s32.totalorder %v208_v54, 15  ;;  %s2257_s27 = sld [smem:[#allocation2 + $0x19]]  ;;  %s2348_s8 = sld [smem:[#allocation2 + $0x8]] }
  0x63   : > { %v347_v37 = vand.u32 4294901760, %v346_v34  ;;  %v822_v63 = vstv %s2196_s16  ;;  %vm2250_vm10 = vcmp.lt.s32.totalorder %v215_v55, 15  ;;  %v836_v5 = vstv %s2198_s17  ;;  %vm2304_vm15 = vmand %vm2246_vm9, %vm230_vm7  ;;  %s2351_s14 = sld [smem:[#allocation2 + $0x11]]  ;;  %s2353_s16 = sld [smem:[#allocation2 + $0x1a]] }
  0x64   : > { %v841_v7 = vstv %s2200_s25  ;;  %v846_v9 = vstv %s2205_s26  ;;  %vm855_vm11 = vcmp.lt.s32.totalorder %v2141_v10, 1  ;;  %vm2262_vm12 = vcmp.ge.s32.totalorder %v208_v54, 1  ;;  %s1551_s26 = scalar_lea.sflag [#allocation4], %s2117_s28  ;;  %p2569_p13 = scmp.ne.s32.totalorder %s2543_s21, 0 }
  0x65   : > { %v348_v38 = vsub.f32 %v346_v34, %v347_v37  ;;  %vm2266_vm13 = vcmp.ge.s32.totalorder %v215_v55, 1  ;;  %vm783_vm14 = vcmp.lt.s32.totalorder %v2141_v10, 17  ;;  %vm894_vm0 = vcmp.lt.s32.totalorder %v2141_v10, 127  ;;  %vm232_vm1 = vmand %vm2262_vm12, %vm230_vm7 }
  0x66   : > { %v909_v33 = vstv %s2225_s3  ;;  %vm918_vm3 = vcmp.lt.s32.totalorder %v2141_v10, 113  ;;  %s1706_s3 = sshll.u32 %s2006_s13, 9 }
  0x67   : > { %v349_v40 = vand.u32 4294901760, %v348_v38  ;;  %v928_v38 = vstv %s2233_s1  ;;  %s2483_s25 = scalar_lea.hbm %s2530_s2, %s1706_s3 }
  0x69   : > { %350 = vmatmul.mubr.f32.vlgmr.msra.gmra.mrb[0].mxu0 %v349_v40 }
  0x6a   : > { %1714 = vmatpush1.bf16.msra.mxu0 %v1713_v39  ;;  %440 = vmatprep.mubr.f32.mxu0 %v2536_v8  ;;  %v933_v39 = vstv %s2241_s18 }
  0x6b   : > { %1716 = vmatprep.subr.bf16.mxu0 %v1715_v41 }
  0x71   : > { %1689 = vmatmul.mubr.msk.f32.vlgmr.msra.gmra.mrb[0].mxu0 %vm272_vm2, %v1686_v31 }
  0x72   : > { %1718 = vmatpush1.bf16.msra.mxu0 %v1717_v42  ;;  %520 = vmatprep.mubr.f32.mxu0 %v2536_v8 }
  0x73   : > { %1720 = vmatprep.subr.bf16.mxu0 %v1707_v12 }
  0x79   : > { %523 = vmatmul.mubr.f32.vlgmr.msra.gmra.mrb[0].mxu0 %v346_v34  ;;  %v923_v34 = vstv %s2231_s0  ;;  %s2568_s0 = sshll.u32 %s2117_s28, 5 }
  0x7a   : > { %1722 = vmatpush1.bf16.msra.mxu0 %v1709_v16  ;;  %597 = vmatprep.mubr.f32.mxu0 %v2536_v8  ;;  %s173_s1 = scalar_lea.vmem [#allocation7], %s2568_s0 }
  0x7b   : > { %1724 = vmatprep.subr.bf16.mxu0 %v1723_v43  ;;  %v952_v43 = vstv %s2255_s24  ;;  %s1564_s18 = sshll.u32 %s173_s1, 4  ;;  %s2476_s18 = int_to_ptr.vmem [resolvable:$true] %s1564_s18 }
  0x7c   : > { %s1883_s13 = scalar_lea.vmem %s2476_s18, 512 }
  0x7d   : > { %p1884_p12 = scmp.ne.s32.totalorder %s2476_s18, %s1883_s13 }
  0x7f   : > { %p1885_p7 = pnand %p1884_p12, %p2569_p13 }
  0x81   : > { %601 = vmatmul.mubr.f32.vlgmr.msra.gmra.mrb[0].mxu0 %v347_v37  ;;  %p1886_p3 = pneg %p1885_p7 }
  0x82   : > { %1726 = vmatpush1.bf16.msra.mxu0 %v1725_v44  ;;  %683 = vmatprep.mubr.f32.mxu0 %v2536_v8 }
  0x83   : > { %1728 = vmatprep.subr.bf16.mxu0 %v1707_v12 }
  0x89   : > { %1690 = vmatmul.mubr.msk.f32.vlgmr.msra.gmra.mrb[0].mxu0 %vm272_vm2, %v1686_v31 }
  0x8a   : > { %1730 = vmatpush1.bf16.msra.mxu0 %v1709_v16  ;;  %759 = vmatprep.mubr.f32.mxu0 %v2536_v8 }
  0x91   : > { %1691 = vmatmul.mubr.msk.f32.vlgmr.msra.gmra.mrb[0].mxu0 %vm272_vm2, %v1686_v31  ;;  %vm239_vm2 = vcmp.lt.s32.totalorder %v2203_v53, 240 }
  0x92   : > { %1094 = vmatprep.mubr.f32.mxu0 %v2536_v8 }
 0x164   : > { %v762_v45 = vpop.f32.mrb[0].mxu0 }
 0x165   : > { %v769_v46 = vrot.slane %v762_v45, 7  ;;  %v764_v47 = vpop.f32.mrb[1].mxu0 }
 0x166   : > { %v770_v48 = vrot.slane %v764_v47, 7 }
 0x167   : > { %v774_v49 = vsel %vm773_vm4, 0.0, %v769_v46 }
 0x168   : > { %v2164_v50 = vsel %vm776_vm5, %v774_v49, 0.0  ;;  %v775_v51 = vsel %vm773_vm4, 0.0, %v770_v48  ;;  %vm942_vm4 = vcmp.lt.s32.totalorder %v2141_v10, 112 }
 0x169   : > { %803 = vrot.lane.b32.xlu1 %v2164_v50, %s2534_s20  ;;  %779 = vrot.lane.b32.xlu0 %v2164_v50, %s1961_s23  ;;  %v2169_v52 = vsel %vm776_vm5, %v775_v51, 0.0  ;;  %v2272_v14 = vmul.f32 %v875_v56, %v2164_v50  ;;  %v2275_v15 = vmul.f32 %v880_v57, %v2164_v50  ;;  %v2283_v21 = vmul.f32 %v885_v58, %v2164_v50 }
 0x16a   : > { %v2280_v20 = vmul.f32 %v875_v56, %v2169_v52  ;;  %v2290_v25 = vmul.f32 %v880_v57, %v2169_v52  ;;  %v2295_v28 = vmul.f32 %v885_v58, %v2169_v52  ;;  %vm966_vm5 = vcmp.lt.s32.totalorder %v2141_v10, 111 }
 0x16d   : > { %827 = vrot.lane.b32.xlu0 %v2164_v50, %s1962_s19  ;;  %805 = vrot.lane.b32.xlu1 %v2169_v52, %s2534_s20  ;;  %s2223_s20 = sld [smem:[#allocation2 + $0xe]] }
 0x171   : > { %851 = vrot.lane.b32.xlu0 %v2164_v50, %s1963_s29  ;;  %829 = vrot.lane.b32.xlu1 %v2169_v52, %s1962_s19  ;;  %s2209_s19 = sld [smem:[#allocation2 + $0xc]] }
 0x173   : > { %v904_v32 = vstv %s2223_s20 }
 0x175   : > { %853 = vrot.lane.b32.xlu1 %v2169_v52, %s1963_s29  ;;  %781 = vrot.lane.b32.xlu0 %v2169_v52, %s1961_s23  ;;  %s2207_s23 = sld [smem:[#allocation2 + $0x3]]  ;;  %s2211_s29 = sld [smem:[#allocation2 + $0x15]] }
 0x177   : > { %v865_v19 = vstv %s2209_s19 }
 0x179   : > { %892 = vrot.lane.b32.xlu1 %v2169_v52, %s1964_s30  ;;  %890 = vrot.lane.b32.xlu0 %v2164_v50, %s1964_s30  ;;  %s2213_s30 = sld [smem:[#allocation2]] }
 0x17b   : > { %v860_v18 = vstv %s2207_s23  ;;  %v870_v23 = vstv %s2211_s29  ;;  %s1968_s23 = smov [#allocation7]  }
 0x17c   : > { %s1887_s19 = sshll.u32 %s1968_s23, 4  ;;  %s1888_s19 = int_to_ptr.vmem [resolvable:$false] %s1887_s19 }
 0x17d   : > { %916 = vrot.lane.b32.xlu1 %v2169_v52, %s1965_s4  ;;  %914 = vrot.lane.b32.xlu0 %v2164_v50, %s1965_s4  ;;  %s2215_s4 = sld [smem:[#allocation2 + $0x9]]  ;;  %s1889_s29 = scalar_lea.vmem %s1888_s19, 1024 }
 0x17e   : > { %p1890_p6 = scmp.lt.s32.totalorder %s2476_s18, %s1888_s19  ;;  %p1891_p4 = scmp.lt.s32.totalorder %s1889_s29, %s1883_s13 }
 0x17f   : > { %v788_v24 = vstv %s2213_s30 }
 0x180   : > { %p1892_p5 = por %p1891_p4, %p1890_p6 }
 0x181   : > { %940 = vrot.lane.b32.xlu1 %v2169_v52, %s1966_s5  ;;  %938 = vrot.lane.b32.xlu0 %v2164_v50, %s1966_s5  ;;  %s2219_s5 = sld [smem:[#allocation2 + $0x12]] }
 0x182   : > { %p1893_p0 = pnand %p1892_p5, %p1886_p3 }
 0x183   : > { %v793_v26 = vstv %s2215_s4 }
 0x185   : > { %964 = vrot.lane.b32.xlu1 %v2169_v52, %s1967_s6  ;;  %962 = vrot.lane.b32.xlu0 %v2164_v50, %s1967_s6  ;;  %s2221_s6 = sld [smem:[#allocation2 + $0x5]] }
 0x187   : > { %v798_v27 = vstv %s2219_s5 }
 0x18b   : > { %v899_v29 = vstv %s2221_s6 }
 0x1db   : > { %v804_v59 = vpop.permute.xlu1 %803  ;;  %v2235_v60 = vpop.permute.xlu0 %779 }
 0x1df   : > { %v828_v16 = vpop.permute.xlu0 %827  ;;  %v806_v17 = vpop.permute.xlu1 %805 }
 0x1e0   : > { %v809_v22 = vsel %vm807_vm6, %v806_v17, %v804_v59  ;;  %v808_v30 = vsel %vm807_vm6, %v804_v59, %v806_v17  ;;  %vm241_vm6 = vmand %vm2266_vm13, %vm239_vm2 }
 0x1e1   : > { %v810_v35 = vsel %vm230_vm7, %v809_v22, 0.0  ;;  %v814_v45 = vmul.f32 %v812_v61, %v808_v30  ;;  %v819_v46 = vmul.f32 %v817_v62, %v808_v30  ;;  %v824_v52 = vmul.f32 %v822_v63, %v808_v30  ;;  %vm243_vm7 = vmand %vm2250_vm10, %vm239_vm2 }
 0x1e2   : > { %v813_v49 = vmul.f32 %v812_v61, %v810_v35  ;;  %v818_v50 = vmul.f32 %v817_v62, %v810_v35  ;;  %v823_v51 = vmul.f32 %v822_v63, %v810_v35 }
 0x1e3   : > { %v852_v36 = vpop.permute.xlu0 %851  ;;  %v830_v37 = vpop.permute.xlu1 %829 }
 0x1e4   : > { %v832_v41 = vsel %vm831_vm8, %v828_v16, %v830_v37  ;;  %v833_v42 = vsel %vm831_vm8, %v830_v37, %v828_v16 }
 0x1e5   : > { %v834_v47 = vsel %vm2304_vm15, %v833_v42, 0.0  ;;  %v835_v48 = vsel %vm2250_vm10, %v832_v41, 0.0  ;;  %vm1021_vm15 = vcmask 1043456  }
 0x1e6   : > { %v837_v54 = vmul.f32 %v836_v5, %v834_v47  ;;  %v838_v55 = vmul.f32 %v836_v5, %v835_v48  ;;  %v842_v56 = vmul.f32 %v841_v7, %v834_v47  ;;  %v843_v57 = vmul.f32 %v841_v7, %v835_v48 }
 0x1e7   : > { %v854_v58 = vpop.permute.xlu1 %853  ;;  %v782_v59 = vpop.permute.xlu0 %781  ;;  %v847_v30 = vmul.f32 %v846_v9, %v834_v47  ;;  %v848_v31 = vmul.f32 %v846_v9, %v835_v48 }
 0x1e8   : > { %v856_v16 = vsel %vm855_vm11, %v852_v36, %v854_v58  ;;  %v857_v61 = vsel %vm855_vm11, %v854_v58, %v852_v36  ;;  %v784_v62 = vsel %vm783_vm14, %v2235_v60, %v782_v59  ;;  %v785_v63 = vsel %vm783_vm14, %v782_v59, %v2235_v60 }
 0x1e9   : > { %v858_v5 = vsel %vm2262_vm12, %v857_v61, 0.0  ;;  %v859_v7 = vsel %vm2266_vm13, %v856_v16, 0.0  ;;  %v786_v17 = vsel %vm232_vm1, %v785_v63, 0.0  ;;  %v787_v22 = vsel %vm2266_vm13, %v784_v62, 0.0 }
 0x1ea   : > { %v861_v35 = vmul.f32 %v860_v18, %v858_v5  ;;  %v862_v36 = vmul.f32 %v860_v18, %v859_v7  ;;  %v866_v37 = vmul.f32 %v865_v19, %v858_v5  ;;  %v867_v60 = vmul.f32 %v865_v19, %v859_v7 }
 0x1eb   : > { %v789_v41 = vmul.f32 %v788_v24, %v786_v17  ;;  %v790_v42 = vmul.f32 %v788_v24, %v787_v22  ;;  %v893_v58 = vpop.permute.xlu1 %892  ;;  %v891_v59 = vpop.permute.xlu0 %890  ;;  %v794_v47 = vmul.f32 %v793_v26, %v786_v17  ;;  %v795_v9 = vmul.f32 %v793_v26, %v787_v22 }
 0x1ec   : > { %v799_v48 = vmul.f32 %v798_v27, %v786_v17  ;;  %v800_v18 = vmul.f32 %v798_v27, %v787_v22  ;;  %v895_v19 = vsel %vm894_vm0, %v891_v59, %v893_v58  ;;  %v896_v24 = vsel %vm894_vm0, %v893_v58, %v891_v59 }
 0x1ed   : > { %v815_v16 = vadd.f32 %v813_v49, %v789_v41  ;;  %v816_v61 = vadd.f32 %v814_v45, %v790_v42  ;;  %v820_v62 = vadd.f32 %v818_v50, %v794_v47  ;;  %v821_v63 = vadd.f32 %v819_v46, %v795_v9 }
 0x1ee   : > { %v825_v8 = vadd.f32 %v823_v51, %v799_v48  ;;  %v826_v40 = vadd.f32 %v824_v52, %v800_v18  ;;  %v871_v44 = vmul.f32 %v870_v23, %v858_v5  ;;  %v872_v26 = vmul.f32 %v870_v23, %v859_v7 }
 0x1ef   : > { %v839_v17 = vadd.f32 %v837_v54, %v815_v16  ;;  %v840_v27 = vadd.f32 %v838_v55, %v816_v61  ;;  %v917_v49 = vpop.permute.xlu1 %916  ;;  %v915_v45 = vpop.permute.xlu0 %914  ;;  %v844_v22 = vadd.f32 %v842_v56, %v820_v62  ;;  %v845_v41 = vadd.f32 %v843_v57, %v821_v63 }
 0x1f0   : > { %v849_v42 = vadd.f32 %v847_v30, %v825_v8  ;;  %v850_v50 = vadd.f32 %v848_v31, %v826_v40  ;;  %v897_v52 = vsel %vm2246_vm9, %v895_v19, 0.0  ;;  %v898_v5 = vsel %vm2250_vm10, %v896_v24, 0.0 }
 0x1f1   : > { %v863_v46 = vadd.f32 %v861_v35, %v839_v17  ;;  %v864_v51 = vadd.f32 %v862_v36, %v840_v27  ;;  %v868_v23 = vadd.f32 %v866_v37, %v844_v22  ;;  %v869_v54 = vadd.f32 %v867_v60, %v845_v41 }
 0x1f2   : > { %v873_v55 = vadd.f32 %v871_v44, %v849_v42  ;;  %v874_v7 = vadd.f32 %v872_v26, %v850_v50  ;;  %v971_v40 = vstv %s2348_s8  ;;  %v976_v56 = vstv %s2351_s14 }
 0x1f3   : > { %v878_v8 = vadd.f32 %v2272_v14, %v863_v46  ;;  %v981_v57 = vstv %s2353_s16  ;;  %v883_v30 = vadd.f32 %v2275_v15, %v868_v23  ;;  %v884_v31 = vadd.f32 %v2290_v25, %v869_v54  ;;  %v941_v36 = vpop.permute.xlu1 %940  ;;  %v939_v14 = vpop.permute.xlu0 %938 }
 0x1f4   : > { %v888_v35 = vadd.f32 %v2283_v21, %v873_v55  ;;  %v889_v44 = vadd.f32 %v2295_v28, %v874_v7  ;;  %v879_v37 = vadd.f32 %v2280_v20, %v864_v51  ;;  %v900_v60 = vmul.f32 %v899_v29, %v897_v52 }
 0x1f5   : > { %v905_v15 = vmul.f32 %v904_v32, %v897_v52  ;;  %v906_v21 = vmul.f32 %v904_v32, %v898_v5  ;;  %v910_v25 = vmul.f32 %v909_v33, %v897_v52  ;;  %v911_v28 = vmul.f32 %v909_v33, %v898_v5 }
 0x1f6   : > { %v919_v13 = vsel %vm918_vm3, %v915_v45, %v917_v49  ;;  %v920_v20 = vsel %vm918_vm3, %v917_v49, %v915_v45  ;;  %v901_v9 = vmul.f32 %v899_v29, %v898_v5  ;;  %v902_v48 = vadd.f32 %v900_v60, %v878_v8 }
 0x1f7   : > { %v907_v58 = vadd.f32 %v905_v15, %v883_v30  ;;  %v908_v59 = vadd.f32 %v906_v21, %v884_v31  ;;  %v921_v47 = vsel %vm2262_vm12, %v919_v13, 0.0  ;;  %v922_v32 = vsel %vm241_vm6, %v920_v20, 0.0  ;;  %v965_v26 = vpop.permute.xlu1 %964  ;;  %v963_v17 = vpop.permute.xlu0 %962 }
 0x1f8   : > { %v912_v33 = vadd.f32 %v910_v25, %v888_v35  ;;  %v913_v18 = vadd.f32 %v911_v28, %v889_v44  ;;  %v929_v16 = vmul.f32 %v928_v38, %v921_v47  ;;  %v930_v61 = vmul.f32 %v928_v38, %v922_v32 }
 0x1f9   : > { %v943_v19 = vsel %vm942_vm4, %v939_v14, %v941_v36  ;;  %v944_v12 = vsel %vm942_vm4, %v941_v36, %v939_v14  ;;  %v903_v24 = vadd.f32 %v901_v9, %v879_v37  ;;  %v924_v29 = vmul.f32 %v923_v34, %v921_v47 }
 0x1fa   : > { %v934_v62 = vmul.f32 %v933_v39, %v921_v47  ;;  %v935_v63 = vmul.f32 %v933_v39, %v922_v32  ;;  %v925_v38 = vmul.f32 %v923_v34, %v922_v32  ;;  %v931_v27 = vadd.f32 %v929_v16, %v907_v58 }
 0x1fb   : > { %v932_v49 = vadd.f32 %v930_v61, %v908_v59  ;;  %v946_v45 = vsel %vm239_vm2, %v944_v12, 0.0  ;;  %v953_v42 = vmul.f32 %v952_v43, %v943_v19  ;;  %v2563_v39 = vstv %s2257_s27 }
 0x1fc   : > { %v936_v22 = vadd.f32 %v934_v62, %v912_v33  ;;  %v937_v41 = vadd.f32 %v935_v63, %v913_v18  ;;  %v954_v50 = vmul.f32 %v952_v43, %v946_v45  ;;  %v958_v46 = vmul.f32 %v2563_v39, %v943_v19 }
 0x1fd   : > { %v2564_v34 = vmov %v2563_v39  ;;  %v967_v52 = vsel %vm966_vm5, %v963_v17, %v965_v26  ;;  %v968_v5 = vsel %vm966_vm5, %v965_v26, %v963_v17  ;;  %v926_v23 = vadd.f32 %v924_v29, %v902_v48 }
 0x1fe   : > { %v959_v51 = vmul.f32 %v2564_v34, %v946_v45  ;;  %v927_v54 = vadd.f32 %v925_v38, %v903_v24  ;;  %v2565_v55 = vstv %s2243_s7  ;;  %v955_v53 = vadd.f32 %v953_v42, %v931_v27 }
 0x1ff   : > { %v948_v7 = vmul.f32 %v2565_v55, %v943_v19  ;;  %v2566_v43 = vmov %v2565_v55  ;;  %v956_v30 = vadd.f32 %v954_v50, %v932_v49  ;;  %v969_v4 = vsel %vm2246_vm9, %v967_v52, 0.0 }
 0x200   : > { %v949_v8 = vmul.f32 %v2566_v43, %v946_v45  ;;  %v970_v31 = vsel %vm243_vm7, %v968_v5, 0.0  ;;  %v972_v35 = vmul.f32 %v971_v40, %v969_v4  ;;  %v977_v36 = vmul.f32 %v976_v56, %v969_v4 }
 0x201   : > { %v973_v44 = vmul.f32 %v971_v40, %v970_v31  ;;  %v978_v14 = vmul.f32 %v976_v56, %v970_v31  ;;  %v960_v37 = vadd.f32 %v958_v46, %v936_v22  ;;  %v961_v60 = vadd.f32 %v959_v51, %v937_v41 }
 0x202   : > { %v982_v15 = vmul.f32 %v981_v57, %v969_v4  ;;  %v983_v21 = vmul.f32 %v981_v57, %v970_v31  ;;  %v950_v25 = vadd.f32 %v948_v7, %v926_v23  ;;  %v951_v28 = vadd.f32 %v949_v8, %v927_v54 }
 0x203   : > { %v979_v13 = vadd.f32 %v977_v36, %v955_v53  ;;  %v980_v20 = vadd.f32 %v978_v14, %v956_v30  ;;  %v258_v48 = vadd.s32 1, %v2141_v10  ;;  %v255_v12 = vmul.u32 4, %v2141_v10 }
 0x204   : > { %v984_v58 = vadd.f32 %v982_v15, %v960_v37  ;;  %v985_v59 = vadd.f32 %v983_v21, %v961_v60  ;;  %v974_v47 = vadd.f32 %v972_v35, %v950_v25  ;;  %v975_v32 = vadd.f32 %v973_v44, %v951_v28 }
 0x205   : > { %v988_v9 = vrot.slane %v979_v13, 1  ;;  %v989_v3 = vrot.slane %v980_v20, 1  ;;  %v259_v24 = vmul.u32 4, %v258_v48  ;;  %vm256_vm8 = vcmp.ge.s32.totalorder %v2143_v11, %v255_v12 }
 0x206   : > { %v996_v18 = vrot.slane %v984_v58, 2  ;;  %v997_v56 = vrot.slane %v985_v59, 2  ;;  %v254_v29 = vadd.s32 8, %v2143_v11  ;;  %v2567_v62 = vmov 0.0  }
 0x207   : > { %v992_v33 = vadd.f32 %v988_v9, %v974_v47  ;;  %v993_v40 = vadd.f32 %v989_v3, %v975_v32  ;;  %vm260_vm9 = vcmp.lt.s32.totalorder %v2143_v11, %v259_v24  ;;  %vm1014_vm11 = vcmask 31744  }
 0x208   : > { %vm262_vm10 = vmand %vm256_vm8, %vm260_vm9  ;;  %vm257_vm12 = vcmp.ge.s32.totalorder %v254_v29, %v255_v12  ;;  %vm261_vm13 = vcmp.lt.s32.totalorder %v254_v29, %v259_v24 }
 0x209   : > { %v1000_v16 = vadd.f32 %v996_v18, %v992_v33  ;;  %v1001_v61 = vadd.f32 %v997_v56, %v993_v40  ;;  %v2446_v63 = vsel %vm262_vm10, 1.0, %v2567_v62  ;;  %vm263_vm14 = vmand %vm257_vm12, %vm261_vm13 }
 0x20a   : > { %v1016_v10 = vsel %vm1014_vm11, %v2446_v63, 0  ;;  %v1688_v45 = vsel %vm263_vm14, 1.0, %v2567_v62 }
 0x20b   : > { %v1692_v19 = vmul.f32 -1.442695, %v1000_v16  ;;  %v1693_v57 = vmul.f32 -1.442695, %v1001_v61  ;;  %v1096_v49 = vsub.f32 %v1016_v10, %v1016_v10  ;;  %v1019_v11 = vsel %vm1014_vm11, %v1688_v45, 0 }
 0x20c   : > { %v1107_v41 = vsub.f32 %v1019_v11, %v1019_v11 }
 0x20d   : > { %1832 = vpow2.f32 %v1692_v19  ;;  %v1097_v22 = vand.u32 4294901760, %v1096_v49 }
 0x20e   : > { %1834 = vpow2.f32 %v1693_v57  ;;  %v1108_v50 = vand.u32 4294901760, %v1107_v41 }
 0x20f   : > { %v1098_v42 = vsub.f32 %v1096_v49, %v1097_v22 }
 0x210   : > { %v1109_v54 = vsub.f32 %v1107_v41, %v1108_v50 }
 0x211   : > { %v1099_v23 = vand.u32 4294901760, %v1098_v42 }
 0x212   : > { %v1110_v53 = vand.u32 4294901760, %v1109_v54 }
 0x217   : > { %v1833_v26 = vpop.eup %1832 }
 0x218   : > { %v1835_v17 = vpop.eup %1834  ;;  %v1008_v38 = vadd.f32 1.0, %v1833_v26 }
 0x219   : > { %v1009_v27 = vadd.f32 1.0, %v1835_v17 }
 0x21a   : > { %1836 = vrcp.f32 %v1008_v38 }
 0x21b   : > { %1838 = vrcp.f32 %v1009_v27 }
 0x224   : > { %v1837_v39 = vpop.eup %1836 }
 0x225   : > { %v1839_v46 = vpop.eup %1838  ;;  %v1023_v34 = vsel %vm1021_vm15, %v1837_v39, 0 }
 0x226   : > { %v1026_v51 = vsel %vm1021_vm15, %v1839_v46, 0  ;;  %v1030_v52 = vand.u32 4294901760, %v1023_v34 }
 0x227   : > { %v1028_v5 = vand.u32 4294901760, %v1026_v51 }
 0x228   : > { %v1124_v55 = vsub.f32 %v1023_v34, %v1030_v52 }
 0x229   : > { %1029 = vmatprep.subr.mxu0 %v1028_v5  ;;  %v1118_v7 = vsub.f32 %v1026_v51, %v1028_v5 }
 0x22a   : > { %1031 = vmatpush1.msra.mxu0 %v1030_v52  ;;  %v1125_v43 = vand.u32 4294901760, %v1124_v55 }
 0x22b   : > { %v1119_v8 = vand.u32 4294901760, %v1118_v7  ;;  %1100 = vmatmul.mubr.f32.vlgmr.msra.gmra.mrb[2].mxu0 %v1099_v23 }
 0x22c   : > { %v1126_v30 = vsub.f32 %v1124_v55, %v1125_v43  ;;  %1105 = vmatprep.mubr.f32.mxu0 %v2567_v62 }
 0x22d   : > { %v1120_v4 = vsub.f32 %v1118_v7, %v1119_v8 }
 0x22e   : > { %v1127_v31 = vand.u32 4294901760, %v1126_v30 }
 0x22f   : > { %v1121_v35 = vand.u32 4294901760, %v1120_v4  ;;  %1111 = vmatmul.mubr.f32.gmra.mrb[4].mxu0 %v1110_v53 }
 0x230   : > { %1191 = vmatprep.mubr.f32.mxu0 %v2567_v62 }
 0x231   : > { %1122 = vmatprep.subr.mxu0 %v1121_v35  ;;  %1731 = vmatprep.subr.mxu1 %v1121_v35 }
 0x232   : > { %1128 = vmatpush1.msra.mxu0 %v1127_v31  ;;  %1732 = vmatpush1.msra.mxu1 %v1127_v31 }
 0x233   : > { %1695 = vmatmul.mubr.msk.f32.vlgmr.msra.gmra.mrb[0].mxu1 %vm1014_vm11, %v1688_v45  ;;  %1208 = vmatprep.subr.mxu1 %v1118_v7 }
 0x234   : > { %1211 = vmatpush1.msra.mxu1 %v1124_v55  ;;  %1274 = vmatprep.mubr.f32.mxu1 %v2567_v62 }
 0x235   : > { %1292 = vmatprep.subr.mxu1 %v1028_v5  ;;  %1694 = vmatmul.mubr.msk.f32.vlgmr.msra.gmra.mrb[2].mxu0 %vm1014_vm11, %v2446_v63 }
 0x237   : > { %1277 = vmatmul.mubr.f32.vlgmr.msra.gmra.mrb[2].mxu1 %v1096_v49 }
 0x238   : > { %1294 = vmatpush1.msra.mxu1 %v1030_v52  ;;  %1282 = vmatprep.mubr.f32.mxu1 %v2567_v62 }
 0x239   : > { %1379 = vmatprep.subr.mxu1 %v1119_v8 }
 0x23b   : > { %1285 = vmatmul.mubr.f32.gmra.mrb[0].mxu1 %v1107_v41 }
 0x23c   : > { %1357 = vmatprep.mubr.f32.mxu1 %v2567_v62 }
 0x23f   : > { %1361 = vmatmul.mubr.f32.vlgmr.msra.gmra.mrb[2].mxu1 %v1097_v22 }
 0x240   : > { %1383 = vmatpush1.msra.mxu1 %v1125_v43  ;;  %1366 = vmatprep.mubr.f32.mxu1 %v2567_v62 }
 0x241   : > { %1462 = vmatprep.subr.mxu1 %v1028_v5 }
 0x243   : > { %1370 = vmatmul.mubr.f32.gmra.mrb[0].mxu1 %v1108_v50 }
 0x244   : > { %1446 = vmatprep.mubr.f32.mxu1 %v2567_v62 }
 0x247   : > { %1696 = vmatmul.mubr.msk.f32.vlgmr.msra.gmra.mrb[2].mxu1 %vm1014_vm11, %v2446_v63 }
 0x248   : > { %1464 = vmatpush1.msra.mxu1 %v1030_v52  ;;  %1453 = vmatprep.mubr.f32.mxu1 %v2567_v62 }
 0x24b   : > { %1697 = vmatmul.mubr.msk.f32.gmra.mrb[0].mxu1 %vm1014_vm11, %v1688_v45 }
 0x24c   : > { %1527 = vmatprep.mubr.f32.mxu1 %v2567_v62 }
 0x24f   : > { %1698 = vmatmul.mubr.msk.f32.vlgmr.msra.gmra.mrb[2].mxu1 %vm1014_vm11, %v2446_v63 }
 0x250   : > { %1534 = vmatprep.mubr.f32.mxu1 %v2567_v62 }
 0x253   : > { %1699 = vmatmul.mubr.msk.f32.gmra.mrb[0].mxu1 %vm1014_vm11, %v1688_v45 }
 0x302   : > { %v1112_v44 = vpop.f32.mrb[4].mxu0 }
 0x303   : > { %v1114_v36 = vpop.f32.mrb[5].mxu0 }
 0x308   : > { %v1194_v14 = vpop.f32.mrb[2].mxu0 }
 0x309   : > { %v1196_v37 = vpop.f32.mrb[3].mxu0 }
 0x322   : > { %v1530_v60 = vpop.f32.mrb[2].mxu1 }
 0x323   : > { %v1733_v15 = vadd.f32 %v1530_v60, %v1194_v14  ;;  %v1532_v21 = vpop.f32.mrb[3].mxu1 }
 0x324   : > { %v1734_v25 = vadd.f32 %v1532_v21, %v1196_v37 }
 0x325   : > { %v1542_v28 = vmul.f32 %v1733_v15, %v2131_v2 }
 0x326   : > { %v1543_v13 = vmul.f32 %v1734_v25, %v2127_v0  ;;  %v1537_v20 = vpop.f32.mrb[0].mxu1 }
 0x327   : > { %1546 = vst [vmem:[%s173_s1] sm:$0xff] %v1542_v28  ;;  %v1735_v58 = vadd.f32 %v1537_v20, %v1112_v44  ;;  %v1539_v59 = vpop.f32.mrb[1].mxu1 }
 0x328   : > { %1547 = vst [vmem:[%s173_s1 + $0x8] sm:$0xff] %v1543_v13  ;;  %v1736_v47 = vadd.f32 %v1539_v59, %v1114_v36 }
 0x329   : > { %v1544_v2 = vmul.f32 %v1735_v58, %v2135_v6 }
 0x32a   : > { %v1545_v32 = vmul.f32 %v1736_v47, %v2129_v1 }
 0x32b   : > { %1548 = vst [vmem:[%s173_s1 + $0x10] sm:$0xff] %v1544_v2 }
 0x32c   : > { %1549 = vst [vmem:[%s173_s1 + $0x18] sm:$0xff] %v1545_v32 }
 0x32d   : > { %1896 = shalt.err (!%p1893_p0)
}
 0x32e   : > { %s1897_s30 = scalar_lea.hbm %s2483_s25, 512  ;;  %s1901_s6 = scalar_lea.hbm %s2530_s2, 1024 }
 0x32f   : > { %p1898_p8 = scmp.ne.s32.totalorder %s2483_s25, %s1897_s30  ;;  %p1902_p1 = scmp.lt.u32.totalorder %s2483_s25, %s2530_s2 }
 0x330   : > { %p1903_p2 = scmp.lt.u32.totalorder %s1901_s6, %s1897_s30  ;;  %p1905_p12 = scmp.lt.u32.totalorder %s1897_s30, %s2483_s25 }
 0x331   : > { %p1899_p9 = pnand %p1898_p8, %p2569_p13 }
 0x332   : > { %p1904_p11 = por %p1903_p2, %p1902_p1 }
 0x333   : > { %p1900_p10 = pneg %p1899_p9 }
 0x334   : > { %p1906_p7 = por %p1905_p12, %p1904_p11 }
 0x336   : > { %p1907_p3 = pnand %p1906_p7, %p1900_p10 }
 0x338   : > { %1910 = shalt.err (!%p1907_p3)
}
 0x339   : > { %s1969_s27 = smov 256   ;;  %s2570_s8 = smov 16  }
 0x33a   : > { %1769 = dma.vmem_to_hbm [thread:$0]  (%p2569_p13), %s2476_s18, 512, %s2483_s25, %s1551_s26, %s1969_s27, %s1969_s27, %s2570_s8  }
 0x33b PF: > { %s1579_s14 = sand.u32 1, %s1941_s9   ;;  %p2571_p6 = scmp.ne.s32.totalorder %s2544_s22, 0 }
 0x33c   : > { %p2572_p4 = scmp.ge.s32.totalorder %s1953_s12, 2  ;;  %s1580_s16 = scalar_lea.sflag [#allocation4], %s1579_s14 }
 0x33e   : > { %p1780_p5 = pnand %p2572_p4, %p2571_p6 }
 0x340   : > { %1936 = dma.done.wait (!%p1780_p5), %s1580_s16, 512  }
 0x341   : > { %1938 = vsyncadd (!%p1780_p5), %s1580_s16, 4294966784  ;;  %s2573_s21 = sld [smem:[#allocation11_spill]]  ;;  %p16_p0 = scmp.ge.s32.totalorder %s2010_s15, 4  }
 0x342   : > { %s2574_s9 = smov %s1945_s10  ;;  %s2575_s10 = smov %s1949_s11 }
 0x343   : > { %s2577_s12 = smov %s2010_s15  ;;  %18 = sbr.rel (!%p16_p0) target bundleno = 9 (0x9), region = 78 }
 0x347   : > { %s2576_s11 = smov %s2573_s21 }
 0x34a   :  { %1585 = vsyncpa [#allocation3], 1 }
 0x34b   :  { %1587 = vsyncpa [#allocation3 + $0x1], 1 }
 0x34c   :  { %1588 = vsyncpa [#allocation4], 1 }
 0x34d   :  { %1590 = vsyncpa [#allocation4 + $0x1], 1 }
 0x34e   :  { %1591 = vsyncpa [#allocation5], 1 }
 0x34f   :  { %1593 = vsyncpa [#allocation5 + $0x1], 1 }

</bundles_post_ra>
